<compile_context>
chip_gen: v6e
topology: v6e:2x2x1
jax: 0.10.0
libtpu: 0.0.40
codegen_flags: <defaults>
</compile_context>

<pallas_src>
import functools
import math

import jax
import jax.numpy as jnp
import numpy as np
from jax.experimental import pallas as pl
from jax.experimental.pallas import tpu as pltpu


def _cdiv(a, b):
    return -(-a // b)


def _is_pow2(w):
    return (w & (w - 1)) == 0


def _finalize(dx, dy, out_dtype, l1):
    if l1:
        return (jnp.abs(dx) + jnp.abs(dy)).astype(out_dtype)
    dx32 = dx.astype(jnp.float32)
    dy32 = dy.astype(jnp.float32)
    return jnp.sqrt(dx32 * dx32 + dy32 * dy32).astype(out_dtype)


def _dx_term(x, is_col0):
    # dx = x[., j-1] - x[., j] with zero padding at column 0 (select, so any
    # garbage brought in by the circular roll never propagates).
    if is_col0 is None:                      # W == 1: every pixel is column 0
        return -x
    x_left = pltpu.roll(x, shift=1, axis=1)
    return jnp.where(is_col0, -x, x_left - x)


# --------------------------------------------------------------------------- #
# Kernels
# --------------------------------------------------------------------------- #
def _grad_flat_kernel(*refs, W, l1, pow2):
    """Block = (TN, H*W): each block row is one whole image, flattened."""
    if pow2:
        x_ref, o_ref = refs
        m_ref = None
    else:
        m_ref, x_ref, o_ref = refs
    x = x_ref[...]                                         # (TN, HW)
    HW = x.shape[-1]
    k = jax.lax.broadcasted_iota(jnp.int32, (1, HW), 1)    # flat pixel index

    if W == 1:
        is_col0 = None
    elif pow2:
        is_col0 = (k & (W - 1)) == 0                       # no side input needed
    else:
        is_col0 = m_ref[...].astype(jnp.int32) != 0        # int8 mask, fetched once
    dx = _dx_term(x, is_col0)

    if HW > W:
        x_up = pltpu.roll(x, shift=W, axis=1)
        dy = jnp.where(k < W, -x, x_up - x)                # zero-pad image row 0
    else:
        dy = -x                                            # single-row image
    o_ref[...] = _finalize(dx, dy, o_ref.dtype, l1)


def _grad_chunk_kernel(*refs, W, l1, pow2):
    """Block = (1, 1, CH): CH = rows*W lanes of one image (CH % 128 == 0 or CH == HW).

    carry_ref holds pltpu.roll(x, W) of the previous chunk of the same image,
    i.e. its first W lanes are that chunk's last row (the dy halo).  The chunk
    grid axis is sequential ("arbitrary") so the carry is valid; chunk 0 of
    every image ignores it via the (k < W) & (c == 0) select, so the scratch
    never needs initialisation (uninitialised data only flows through selects).
    """
    if pow2:
        x_ref, o_ref, carry_ref = refs
        m_ref = None
    else:
        m_ref, x_ref, o_ref, carry_ref = refs
    c = pl.program_id(1)
    x = x_ref[0]                                           # (1, CH)
    CH = x.shape[-1]
    k = jax.lax.broadcasted_iota(jnp.int32, (1, CH), 1)    # chunk-local index

    if W == 1:
        is_col0 = None
    elif pow2:
        is_col0 = (k & (W - 1)) == 0        # chunk start is a multiple of W
    else:
        is_col0 = m_ref[0].astype(jnp.int32) != 0
    dx = _dx_term(x, is_col0)

    first = k < W                           # first image-row of this chunk
    r = pltpu.roll(x, shift=W % CH, axis=1)
    up = jnp.where(first, carry_ref[...], r)               # splice halo row
    dy = jnp.where(jnp.logical_and(first, c == 0), -x, up - x)
    carry_ref[...] = r                      # halo for the next chunk
    o_ref[0] = _finalize(dx, dy, o_ref.dtype, l1)


# --------------------------------------------------------------------------- #
# Host-side helpers
# --------------------------------------------------------------------------- #
def _chip_config():
    """Generation-aware (block_bytes, vmem_limit_bytes, tensorcores) defaults."""
    vmem_cap = 0
    try:
        vmem_cap = int(pltpu.get_tpu_info().vmem_capacity_bytes)
    except Exception:
        vmem_cap = 0
    kind = ""
    try:
        kind = jax.devices()[0].device_kind.lower()
    except Exception:
        kind = ""
    # v5e / v6e have one TensorCore per chip; v7x (and v4/v5p) expose two.
    single_core = any(
        t in kind for t in ("v5e", "v5 lite", "v5lite", "v6e", "v6 lite", "v6lite")
    )
    if vmem_cap <= 0:
        vmem_cap = 128 * 1024 * 1024 if single_core else 64 * 1024 * 1024
    if vmem_cap >= 100 * 1024 * 1024:        # 128 MiB VMEM class (v5e/v6e/v5p)
        return 8 * 1024 * 1024, 96 * 1024 * 1024, (1 if single_core else 2)
    # 64 MiB / TensorCore class (v7x) or unknown: stay conservative.
    return 4 * 1024 * 1024, 48 * 1024 * 1024, 2


@functools.lru_cache(maxsize=None)
def _col0_mask(n_lanes, W, ndim):
    """int8 mask (1 where flat index is column 0 of its image row); cached."""
    m = (np.arange(n_lanes) % W == 0).astype(np.int8)
    return jnp.asarray(m.reshape((1,) * (ndim - 1) + (n_lanes,)))


def _pick_tn(N, sub, row_bytes, block_bytes, cores):
    """Images per block for the fast path (sublane count)."""
    if N <= sub:
        return N                              # single full-extent block
    tn = max(sub, (block_bytes // max(row_bytes, 1)) // sub * sub)
    tn = min(tn, _cdiv(N, sub) * sub)
    if cores >= 2:
        # At least two grid steps so both TensorCores get work ...
        tn = min(tn, sub * _cdiv(N, 2 * sub))
        # ... and prefer an even step count for load balance.
        steps = _cdiv(N, tn)
        if steps > 1 and steps % 2 == 1:
            alt = tn - sub
            while alt >= sub and _cdiv(N, alt) % 2 == 1:
                alt -= sub
            if alt >= sub:
                tn = alt
    return tn


def tensor_gradient(img, l1: bool = True, *, block_bytes=None):
    """img: (B, C, H, W) float array -> (B, C, H, W) gradient magnitude."""
    if img.ndim != 4:
        raise ValueError("expected NCHW input")
    B, C, H, W = map(int, img.shape)
    N = B * C
    HW = H * W
    dtype = img.dtype
    itemsize = jnp.dtype(dtype).itemsize
    sub = max(8, 32 // itemsize)              # dtype-aware sublane multiple
    pow2 = _is_pow2(W)

    def_block, vmem_limit, cores = _chip_config()
    if block_bytes is None:
        block_bytes = def_block

    row_bytes = HW * itemsize
    mask_bytes = 0 if pow2 else HW            # int8 column mask, fetched once
    cost = pl.CostEstimate(
        flops=8 * N * HW,
        transcendentals=0 if l1 else N * HW,
        bytes_accessed=2 * N * HW * itemsize + mask_bytes,
    )

    min_rows = N if N < sub else sub
    if min_rows * row_bytes <= block_bytes:
        # ----- fast path: (tn, H*W) lane/sublane-dense slabs of whole images -----
        x = img.reshape(N, HW)
        tn = _pick_tn(N, sub, row_bytes, block_bytes, cores)
        grid = (_cdiv(N, tn),)
        in_specs, args = [], []
        if not pow2:
            in_specs.append(pl.BlockSpec((1, HW), lambda i: (0, 0)))
            args.append(_col0_mask(HW, W, 2))
        in_specs.append(pl.BlockSpec((tn, HW), lambda i: (i, 0)))
        args.append(x)
        out = pl.pallas_call(
            functools.partial(_grad_flat_kernel, W=W, l1=l1, pow2=pow2),
            out_shape=jax.ShapeDtypeStruct((N, HW), dtype),
            grid=grid,
            in_specs=in_specs,
            out_specs=pl.BlockSpec((tn, HW), lambda i: (i, 0)),
            compiler_params=pltpu.CompilerParams(
                dimension_semantics=("parallel",),
                vmem_limit_bytes=vmem_limit,
            ),
            cost_estimate=cost,
        )(*args)
        return out.reshape(B, C, H, W)

    # ----- chunked path: lane-dense chunks of one image + carried dy halo -----
    # Chunk length CH is a multiple of both W (column mask is chunk-invariant,
    # no per-chunk offset math) and 128 (every store is lane-dense, even W<128).
    # TODO(synk): pathological very wide W with gcd(W,128)==1 can make the
    # minimum aligned chunk exceed the VMEM budget; tile along W too if needed.
    rows_align = 128 // math.gcd(W, 128)
    target_elems = max(1, block_bytes // itemsize)
    chunk_rows = max(rows_align, (target_elems // (rows_align * W)) * rows_align)
    CH = chunk_rows * W
    if CH >= HW:
        CH = HW
    n_chunks = _cdiv(HW, CH)

    x = img.reshape(N, 1, HW)
    grid = (N, n_chunks)
    in_specs, args = [], []
    if not pow2:
        in_specs.append(pl.BlockSpec((1, 1, CH), lambda n, c: (0, 0, 0)))
        args.append(_col0_mask(CH, W, 3))
    in_specs.append(pl.BlockSpec((1, 1, CH), lambda n, c: (n, 0, c)))
    args.append(x)
    out = pl.pallas_call(
        functools.partial(_grad_chunk_kernel, W=W, l1=l1, pow2=pow2),
        out_shape=jax.ShapeDtypeStruct((N, 1, HW), dtype),
        grid=grid,
        in_specs=in_specs,
        out_specs=pl.BlockSpec((1, 1, CH), lambda n, c: (n, 0, c)),
        scratch_shapes=[pltpu.VMEM((1, CH), dtype)],
        compiler_params=pltpu.CompilerParams(
            dimension_semantics=("parallel", "arbitrary"),
            vmem_limit_bytes=vmem_limit,
        ),
        cost_estimate=cost,
    )(*args)
    return out.reshape(B, C, H, W)


# --------------------------------------------------------------------------- #
# Pure-JAX reference (mirror of the PyTorch forward) and tests
# --------------------------------------------------------------------------- #
def _reference(img, l1=True):
    H, W = img.shape[-2], img.shape[-1]
    zpad = [(0, 0)] * (img.ndim - 2)
    l = jnp.pad(img, zpad + [(0, 0), (1, 0)])
    r = jnp.pad(img, zpad + [(0, 0), (0, 1)])
    u = jnp.pad(img, zpad + [(1, 0), (0, 0)])
    d = jnp.pad(img, zpad + [(0, 1), (0, 0)])
    gx = (l - r)[..., :H, :W]
    gy = (u - d)[..., :H, :W]
    if l1:
        return jnp.abs(gx) + jnp.abs(gy)
    return jnp.sqrt(gx * gx + gy * gy)


if __name__ == "__main__":
    key = jax.random.PRNGKey(0)
    k1, k2, k3, k4 = jax.random.split(key, 4)

    # 1) Fast path, power-of-two width (no mask side input), L1 and L2.
    x1 = jax.random.normal(k1, (2, 4, 16, 16), dtype=jnp.float32)
    y1_l1 = tensor_gradient(x1, l1=True)
    y1_l2 = tensor_gradient(x1, l1=False)
    jax.block_until_ready((y1_l1, y1_l2))
    assert y1_l1.shape == x1.shape and y1_l1.dtype == x1.dtype
    assert jnp.allclose(y1_l1, _reference(x1, True), atol=1e-5), "flat pow2 L1 mismatch"
    assert jnp.allclose(y1_l2, _reference(x1, False), atol=1e-5), "flat pow2 L2 mismatch"

    # 2) Fast path, non-power-of-two width (int8 column mask), L1 and L2.
    x2 = jax.random.normal(k2, (2, 2, 12, 24), dtype=jnp.float32)
    y2_l1 = tensor_gradient(x2, l1=True)
    y2_l2 = tensor_gradient(x2, l1=False)
    jax.block_until_ready((y2_l1, y2_l2))
    assert jnp.allclose(y2_l1, _reference(x2, True), atol=1e-5), "flat mask L1 mismatch"
    assert jnp.allclose(y2_l2, _reference(x2, False), atol=1e-5), "flat mask L2 mismatch"

    # 3) Chunked path (lane-dense chunks + carried halo), forced via tiny block budget.
    x3 = jax.random.normal(k3, (1, 2, 64, 128), dtype=jnp.float32)
    y3_l1 = tensor_gradient(x3, l1=True, block_bytes=16 * 1024)
    y3_l2 = tensor_gradient(x3, l1=False, block_bytes=16 * 1024)
    jax.block_until_ready((y3_l1, y3_l2))
    assert jnp.allclose(y3_l1, _reference(x3, True), atol=1e-5), "chunk pow2 L1 mismatch"
    assert jnp.allclose(y3_l2, _reference(x3, False), atol=1e-5), "chunk pow2 L2 mismatch"

    # 4) Chunked path with non-power-of-two width (W < 128, still lane-dense).
    x4 = jax.random.normal(k4, (1, 1, 96, 24), dtype=jnp.float32)
    y4_l1 = tensor_gradient(x4, l1=True, block_bytes=2 * 1024)
    y4_l2 = tensor_gradient(x4, l1=False, block_bytes=2 * 1024)
    jax.block_until_ready((y4_l1, y4_l2))
    assert jnp.allclose(y4_l1, _reference(x4, True), atol=1e-5), "chunk mask L1 mismatch"
    assert jnp.allclose(y4_l2, _reference(x4, False), atol=1e-5), "chunk mask L2 mismatch"

    # 5) bfloat16 input (dtype-aware sublane rounding), L1.
    x5 = jax.random.normal(k1, (2, 8, 16, 16), dtype=jnp.float32).astype(jnp.bfloat16)
    y5 = tensor_gradient(x5, l1=True)
    jax.block_until_ready(y5)
    assert y5.dtype == jnp.bfloat16
    assert jnp.allclose(
        y5.astype(jnp.float32), _reference(x5, True).astype(jnp.float32), atol=2e-2
    ), "bf16 L1 mismatch"

    print("KERNEL_OK")
</pallas_src>

<mosaic_0001>
module attributes {stable_mosaic.version = 11 : i64} {
  func.func @_grad_flat_kernel(%arg0: i32, %arg1: memref<8x256xf32, #tpu.memory_space<vmem>>, %arg2: memref<8x256xf32, #tpu.memory_space<vmem>>) attributes {dimension_semantics = [#tpu.dimension_semantics<parallel>], iteration_bounds = array<i64: 1>, scalar_prefetch = 0 : i64, scratch_operands = 0 : i64, tpu.core_type = #tpu.core_type<tc>, window_params = [{transform_indices = @transform_0, window_bounds = array<i64: 8, 256>}, {transform_indices = @transform_1, window_bounds = array<i64: 8, 256>}]} {
    %c0 = arith.constant 0 : index
    %c0_0 = arith.constant 0 : index
    %0 = vector.load %arg1[%c0, %c0_0] : memref<8x256xf32, #tpu.memory_space<vmem>>, vector<8x256xf32>
    %1 = tpu.iota {dimensions = array<i32: 1>} : vector<1x256xi32>
    %c15_i32 = arith.constant 15 : i32
    %2 = vector.broadcast %c15_i32 : i32 to vector<1x256xi32>
    %3 = arith.andi %1, %2 : vector<1x256xi32>
    %c0_i32 = arith.constant 0 : i32
    %4 = vector.broadcast %c0_i32 : i32 to vector<1x256xi32>
    %5 = arith.cmpi eq, %3, %4 : vector<1x256xi32>
    %c1_i32 = arith.constant 1 : i32
    %6 = tpu.dynamic_rotate %0 by %c1_i32 dim 1 : vector<8x256xf32>, i32 -> vector<8x256xf32>
    %cst = arith.constant 0.000000e+00 : f32
    %7 = vector.broadcast %cst : f32 to vector<8x256xf32>
    %8 = arith.subf %7, %0 : vector<8x256xf32>
    %9 = arith.subf %6, %0 : vector<8x256xf32>
    %10 = vector.shape_cast %5 : vector<1x256xi1> to vector<1x256xi1>
    %11 = vector.broadcast %10 : vector<1x256xi1> to vector<8x256xi1>
    %12 = arith.select %11, %8, %9 : vector<8x256xi1>, vector<8x256xf32>
    %c16_i32 = arith.constant 16 : i32
    %13 = tpu.dynamic_rotate %0 by %c16_i32 dim 1 : vector<8x256xf32>, i32 -> vector<8x256xf32>
    %c16_i32_1 = arith.constant 16 : i32
    %14 = vector.broadcast %c16_i32_1 : i32 to vector<1x256xi32>
    %15 = arith.cmpi slt, %1, %14 : vector<1x256xi32>
    %cst_2 = arith.constant 0.000000e+00 : f32
    %16 = vector.broadcast %cst_2 : f32 to vector<8x256xf32>
    %17 = arith.subf %16, %0 : vector<8x256xf32>
    %18 = arith.subf %13, %0 : vector<8x256xf32>
    %19 = vector.shape_cast %15 : vector<1x256xi1> to vector<1x256xi1>
    %20 = vector.broadcast %19 : vector<1x256xi1> to vector<8x256xi1>
    %21 = arith.select %20, %17, %18 : vector<8x256xi1>, vector<8x256xf32>
    %22 = math.absf %12 : vector<8x256xf32>
    %23 = math.absf %21 : vector<8x256xf32>
    %24 = arith.addf %22, %23 : vector<8x256xf32>
    %c0_3 = arith.constant 0 : index
    %c0_4 = arith.constant 0 : index
    %25 = vector.load %arg2[%c0_3, %c0_4] : memref<8x256xf32, #tpu.memory_space<vmem>>, vector<8x256xf32>
    tpu.vector_store %arg2[%c0_3, %c0_4], %24 {strides = array<i32>} : memref<8x256xf32, #tpu.memory_space<vmem>>, vector<8x256xf32>,
    return
  }
  func.func @transform_0(%arg0: i32) -> (i32, i32) {
    %c0_i32 = arith.constant 0 : i32
    %c0_i32_0 = arith.constant 0 : i32
    return %arg0, %c0_i32 : i32, i32
  }
  func.func @transform_1(%arg0: i32) -> (i32, i32) {
    %c0_i32 = arith.constant 0 : i32
    %c0_i32_0 = arith.constant 0 : i32
    return %arg0, %c0_i32 : i32, i32
  }
}

</mosaic_0001>

<bundles_post_ra>
// kernel: tpu_custom_call.1
= control target key start
LH: loop header
LB: loop body
LE: loop exit
PB: predicated region body
PF: predicated region fallthrough
CT: control target
= control target key end

     0   :  { %6 = vsyncpa [#allocation3], 0  ;;  %s157_s0 = inlined_call_operand.hbm [shape: f32[8,256], index: 0, kind: input, shape index: {}]   ;;  %s158_s1 = inlined_call_operand.hbm [shape: f32[8,256], index: 1, kind: output, shape index: {}]  }
   0x1   :  { %7 = vsyncpa [#allocation4], 0  ;;  %s134_s6 = smov [#allocation2]  }
   0x2   :  { %s14_s7 = sshll.u32 %s134_s6, 4  ;;  %s15_s7 = int_to_ptr.vmem [resolvable:$true] %s14_s7 }
   0x3   :  { %s98_s8 = scalar_lea.vmem %s15_s7, 256  ;;  %p103_p1 = scmp.lt.s32.totalorder %s15_s7, %s15_s7 }
   0x4   :  { %p99_p0 = scmp.ne.s32.totalorder %s15_s7, %s98_s8  ;;  %p104_p2 = scmp.lt.s32.totalorder %s98_s8, %s98_s8 }
   0x6   :  { %p105_p3 = por %p104_p2, %p103_p1 }
   0x8   :  { %p106_p4 = pnand %p105_p3, %p99_p0 }
   0xa   :  { %109 = shalt.err (!%p106_p4)
}
   0xb   :  { %17 = dma.hbm_to_vmem [thread:$0]  %s157_s0, 256, %s15_s7, [#allocation3]  }
   0xc   :  { %130 = dma.done.wait [#allocation3], 256  }
   0xd   :  { %131 = vsyncadd [#allocation3], 4294967040  ;;  %v21_v0 = vld [vmem:[#allocation2] sm:$0xff]  ;;  %s135_s11 = smov 16   ;;  %s136_s12 = smov 1   ;;  %v22_v1 = vld [vmem:[#allocation2 + $0x8] sm:$0xff]  ;;  %v23_v2 = vlaneseq }
   0xe   :  { %47 = vrot.lane.b32.xlu1 %v21_v0, %s135_s11  ;;  %30 = vrot.lane.b32.xlu0 %v21_v0, %s136_s12  ;;  %v37_v10 = vsub.f32 0.0, %v21_v0  ;;  %v38_v11 = vsub.f32 0.0, %v22_v1  ;;  %s137_s0 = smov [#allocation5]  }
   0xf   :  { %v24_v3 = vand.u32 127, %v23_v2  ;;  %s77_s13 = sshll.u32 %s137_s0, 4  ;;  %s78_s13 = int_to_ptr.vmem [resolvable:$true] %s77_s13 }
  0x10   :  { %s110_s14 = scalar_lea.vmem %s78_s13, 256  ;;  %p115_p6 = scmp.lt.s32.totalorder %s78_s13, %s78_s13 }
  0x11   :  { %v25_v4 = vadd.s32 128, %v24_v3  ;;  %v26_v7 = vand.u32 15, %v24_v3  ;;  %vm51_vm0 = vcmp.lt.s32.totalorder %v24_v3, 16  ;;  %vm34_vm1 = vcmp.lt.s32.totalorder %v24_v3, 1  ;;  %p111_p5 = scmp.ne.s32.totalorder %s78_s13, %s110_s14  ;;  %p116_p7 = scmp.lt.s32.totalorder %s110_s14, %s110_s14 }
  0x12   :  { %49 = vrot.lane.b32.xlu1 %v22_v1, %s135_s11  ;;  %32 = vrot.lane.b32.xlu0 %v22_v1, %s136_s12 }
  0x13   :  { %v27_v8 = vand.u32 15, %v25_v4  ;;  %vm28_vm2 = vcmp.eq.s32.totalorder %v26_v7, 0  ;;  %p117_p8 = por %p116_p7, %p115_p6 }
  0x15   :  { %vm29_vm3 = vcmp.eq.s32.totalorder %v27_v8, 0  ;;  %p118_p9 = pnand %p117_p8, %p111_p5 }
  0x80   :  { %v48_v5 = vpop.permute.xlu1 %47  ;;  %v31_v6 = vpop.permute.xlu0 %30 }
  0x84   :  { %v50_v9 = vpop.permute.xlu1 %49  ;;  %v33_v12 = vpop.permute.xlu0 %32 }
  0x85   :  { %v52_v13 = vsel %vm51_vm0, %v48_v5, %v50_v9  ;;  %v53_v14 = vsel %vm51_vm0, %v50_v9, %v48_v5  ;;  %v35_v15 = vsel %vm34_vm1, %v31_v6, %v33_v12  ;;  %v36_v16 = vsel %vm34_vm1, %v33_v12, %v31_v6 }
  0x86   :  { %v55_v17 = vsub.f32 %v53_v14, %v21_v0  ;;  %v56_v18 = vsub.f32 %v52_v13, %v22_v1  ;;  %v39_v19 = vsub.f32 %v36_v16, %v21_v0  ;;  %v40_v20 = vsub.f32 %v35_v15, %v22_v1 }
  0x88   :  { %v61_v21 = vsel %vm51_vm0, %v37_v10, %v55_v17  ;;  %v66_v22 = vand.u32 2147483647, %v56_v18  ;;  %v45_v23 = vsel %vm28_vm2, %v37_v10, %v39_v19  ;;  %v46_v24 = vsel %vm29_vm3, %v38_v11, %v40_v20 }
  0x89   :  { %v65_v25 = vand.u32 2147483647, %v61_v21  ;;  %v63_v26 = vand.u32 2147483647, %v45_v23  ;;  %v64_v27 = vand.u32 2147483647, %v46_v24 }
  0x8b   :  { %v67_v28 = vadd.f32 %v65_v25, %v63_v26  ;;  %v68_v29 = vadd.f32 %v66_v22, %v64_v27 }
  0x8d   :  { %69 = vst [vmem:[#allocation5] sm:$0xff] %v67_v28  ;;  %70 = vst [vmem:[#allocation5 + $0x8] sm:$0xff] %v68_v29 }
  0x8e   :  { %121 = shalt.err (!%p118_p9)
}
  0x8f   :  { %80 = dma.vmem_to_hbm [thread:$0]  %s78_s13, 256, %s158_s1, [#allocation4]  }
  0x90   :  { %132 = dma.done.wait [#allocation4], 256  }
  0x91   :  { %133 = vsyncadd [#allocation4], 4294967040 }
  0x92   :  { %84 = vsyncpa [#allocation3], 1 }
  0x93   :  { %85 = vsyncpa [#allocation4], 1 }

</bundles_post_ra>
